<compile_context>
chip_gen: v6e
topology: v6e:2x2x1
jax: 0.10.0
libtpu: 0.0.40
codegen_flags: <defaults>
</compile_context>

<pallas_src>
import jax
import jax.numpy as jnp
from jax.experimental import pallas as pl
from jax.experimental.pallas import tpu as pltpu

IN_FEATURES = 784   # 1 * 28 * 28 (MNIST)
OUT_FEATURES = 10


def _round_up(n, m):
    return ((n + m - 1) // m) * m


def net_kernel(x_ref, w_ref, b_ref, o_ref):
    # x_ref: (TB, 784) bf16   w_ref: (784, 10) bf16
    # b_ref: (1, 10)   f32    o_ref: (TB, 10)  f32
    logits = jnp.dot(x_ref[...], w_ref[...],
                     preferred_element_type=jnp.float32) + b_ref[...]

    # Numerically stable softmax along dim=1 (feature axis), all in f32.
    m = jnp.max(logits, axis=-1, keepdims=True)
    e = jnp.exp(logits - m)
    denom = jnp.sum(e, axis=-1, keepdims=True)
    # Divide -> EUP reciprocal (separate VLIW slot, effectively free).
    o_ref[...] = (e * pl.reciprocal(denom, approx=True)).astype(o_ref.dtype)


def net_forward(x_nchw, weight, bias, *, tile_b=1024):
    """x_nchw: (B, 1, 28, 28); weight: (10, 784); bias: (10,)."""
    B = x_nchw.shape[0]
    # nn.Flatten(): (N, C, H, W) -> (N, C*H*W), row-major — same as reshape.
    x_flat = x_nchw.reshape(B, -1)
    assert x_flat.shape[1] == IN_FEATURES

    # bf16 activations/weights halve HBM traffic on the binding x read;
    # the kernel accumulates in f32.
    x_bf16 = x_flat.astype(jnp.bfloat16)
    w_bf16 = weight.T.astype(jnp.bfloat16)                 # (784, 10)
    b_f32 = bias.reshape(1, OUT_FEATURES).astype(jnp.float32)

    # Batch tile: multiple of 8 (sublane), capped so double-buffered x tiles
    # fit under every generation's scoped-VMEM default (no vmem_limit needed).
    tb = min(tile_b, _round_up(B, 8))
    b_pad = _round_up(B, tb)
    if b_pad != B:
        x_bf16 = jnp.pad(x_bf16, ((0, b_pad - B), (0, 0)))

    out = pl.pallas_call(
        net_kernel,
        out_shape=jax.ShapeDtypeStruct((b_pad, OUT_FEATURES), jnp.float32),
        grid=(b_pad // tb,),
        in_specs=[
            pl.BlockSpec((tb, IN_FEATURES), lambda i: (i, 0)),
            pl.BlockSpec((IN_FEATURES, OUT_FEATURES), lambda i: (0, 0)),
            pl.BlockSpec((1, OUT_FEATURES), lambda i: (0, 0)),
        ],
        out_specs=pl.BlockSpec((tb, OUT_FEATURES), lambda i: (i, 0)),
        compiler_params=pltpu.CompilerParams(
            dimension_semantics=("parallel",)),
    )(x_bf16, w_bf16, b_f32)
    return out[:B]


if __name__ == "__main__":
    key = jax.random.PRNGKey(0)
    kx, kw, kb = jax.random.split(key, 3)

    # Small, MNIST-consistent input: batch=2, NCHW (2, 1, 28, 28).
    B = 2
    x = jax.random.normal(kx, (B, 1, 28, 28), dtype=jnp.float32)

    # Deterministic parameter init (PyTorch Linear-style uniform bound).
    bound = 1.0 / (IN_FEATURES ** 0.5)
    weight = jax.random.uniform(
        kw, (OUT_FEATURES, IN_FEATURES), minval=-bound, maxval=bound,
        dtype=jnp.float32)
    bias = jax.random.uniform(
        kb, (OUT_FEATURES,), minval=-bound, maxval=bound, dtype=jnp.float32)

    # TODO(synk): LinearMem's "memory_state" bookkeeping (training-time state
    # tracking) has no effect on the forward math, so only the Linear fwd is
    # implemented.

    out = net_forward(x, weight, bias)
    jax.block_until_ready(out)
    assert out.shape == (B, OUT_FEATURES)

    # Reference with the same bf16 input rounding (f32 accumulation).
    x_flat = x.reshape(B, -1)
    ref_bf16 = jax.nn.softmax(
        x_flat.astype(jnp.bfloat16).astype(jnp.float32)
        @ weight.T.astype(jnp.bfloat16).astype(jnp.float32) + bias, axis=1)
    # Full-precision f32 reference (looser tolerance: bf16 inputs + approx rcp).
    ref_f32 = jax.nn.softmax(x_flat @ weight.T + bias, axis=1)

    assert jnp.allclose(out, ref_bf16, atol=2e-3, rtol=1e-2)
    assert jnp.allclose(out, ref_f32, atol=1e-2, rtol=1e-2)
    assert jnp.allclose(jnp.sum(out, axis=1), 1.0, atol=2e-3)

    print("KERNEL_OK")
</pallas_src>

<mosaic_0001>
module attributes {stable_mosaic.version = 11 : i64} {
  func.func @net_kernel(%arg0: i32, %arg1: memref<8x784xbf16, #tpu.memory_space<vmem>>, %arg2: memref<784x10xbf16, #tpu.memory_space<vmem>>, %arg3: memref<1x10xf32, #tpu.memory_space<vmem>>, %arg4: memref<8x10xf32, #tpu.memory_space<vmem>>) attributes {dimension_semantics = [#tpu.dimension_semantics<parallel>], iteration_bounds = array<i64: 1>, scalar_prefetch = 0 : i64, scratch_operands = 0 : i64, tpu.core_type = #tpu.core_type<tc>, window_params = [{transform_indices = @transform_0, window_bounds = array<i64: 8, 784>}, {pipeline_mode = #tpu.pipeline_mode<synchronous>, transform_indices = @transform_1, window_bounds = array<i64: 784, 10>}, {pipeline_mode = #tpu.pipeline_mode<synchronous>, transform_indices = @transform_2, window_bounds = array<i64: 1, 10>}, {transform_indices = @transform_3, window_bounds = array<i64: 8, 10>}]} {
    %c0 = arith.constant 0 : index
    %c0_0 = arith.constant 0 : index
    %0 = vector.load %arg1[%c0, %c0_0] : memref<8x784xbf16, #tpu.memory_space<vmem>>, vector<8x784xbf16>
    %c0_1 = arith.constant 0 : index
    %c0_2 = arith.constant 0 : index
    %1 = vector.load %arg2[%c0_1, %c0_2] : memref<784x10xbf16, #tpu.memory_space<vmem>>, vector<784x10xbf16>
    %cst = arith.constant dense<0.000000e+00> : vector<8x10xf32>
    %2 = tpu.matmul %0, %1, %cst {dimension_numbers = #tpu.dot_dimension_numbers<[1], [0], [0], [1], [0, 0, 1, 1], [], []>} : vector<8x784xbf16>, vector<784x10xbf16>, vector<8x10xf32> -> vector<8x10xf32>
    %c0_3 = arith.constant 0 : index
    %c0_4 = arith.constant 0 : index
    %3 = vector.load %arg3[%c0_3, %c0_4] : memref<1x10xf32, #tpu.memory_space<vmem>>, vector<1x10xf32>
    %4 = vector.broadcast %3 : vector<1x10xf32> to vector<8x10xf32>
    %5 = arith.addf %2, %4 : vector<8x10xf32>
    %cst_5 = arith.constant dense<0xFF800000> : vector<8xf32>
    %6 = vector.multi_reduction <maximumf>, %5, %cst_5 [1] : vector<8x10xf32> to vector<8xf32>
    %7 = vector.shape_cast %6 : vector<8xf32> to vector<8x1xf32>
    %8 = vector.broadcast %7 : vector<8x1xf32> to vector<8x10xf32>
    %9 = arith.subf %5, %8 : vector<8x10xf32>
    %10 = math.exp %9 : vector<8x10xf32>
    %cst_6 = arith.constant dense<0.000000e+00> : vector<8xf32>
    %11 = vector.multi_reduction <add>, %10, %cst_6 [1] : vector<8x10xf32> to vector<8xf32>
    %12 = vector.shape_cast %11 : vector<8xf32> to vector<8x1xf32>
    %13 = tpu.reciprocal %12 {approx = true} : vector<8x1xf32> -> vector<8x1xf32>
    %14 = vector.broadcast %13 : vector<8x1xf32> to vector<8x10xf32>
    %15 = arith.mulf %10, %14 : vector<8x10xf32>
    %c0_7 = arith.constant 0 : index
    %c0_8 = arith.constant 0 : index
    %16 = vector.load %arg4[%c0_7, %c0_8] : memref<8x10xf32, #tpu.memory_space<vmem>>, vector<8x10xf32>
    tpu.vector_store %arg4[%c0_7, %c0_8], %15 {strides = array<i32>} : memref<8x10xf32, #tpu.memory_space<vmem>>, vector<8x10xf32>,
    return
  }
  func.func @transform_0(%arg0: i32) -> (i32, i32) {
    %c0_i32 = arith.constant 0 : i32
    %c0_i32_0 = arith.constant 0 : i32
    return %arg0, %c0_i32 : i32, i32
  }
  func.func @transform_1(%arg0: i32) -> (i32, i32) {
    %c0_i32 = arith.constant 0 : i32
    %c0_i32_0 = arith.constant 0 : i32
    %c0_i32_1 = arith.constant 0 : i32
    return %c0_i32, %c0_i32_0 : i32, i32
  }
  func.func @transform_2(%arg0: i32) -> (i32, i32) {
    %c0_i32 = arith.constant 0 : i32
    %c0_i32_0 = arith.constant 0 : i32
    %c0_i32_1 = arith.constant 0 : i32
    return %c0_i32, %c0_i32_0 : i32, i32
  }
  func.func @transform_3(%arg0: i32) -> (i32, i32) {
    %c0_i32 = arith.constant 0 : i32
    %c0_i32_0 = arith.constant 0 : i32
    return %arg0, %c0_i32 : i32, i32
  }
}

</mosaic_0001>

<bundles_post_ra>
// kernel: tpu_custom_call.1
= control target key start
LH: loop header
LB: loop body
LE: loop exit
PB: predicated region body
PF: predicated region fallthrough
CT: control target
= control target key end

     0   :  { %v851_v43 = vmov 0.0   ;;  %vm852_vm0 = vmmov 0   ;;  %s1042_s0 = inlined_call_operand.vmem [shape: bf16[8,784], index: 0, kind: input, shape index: {}]   ;;  %s1043_s1 = inlined_call_operand.vmem [shape: bf16[784,10], index: 1, kind: input, shape index: {}]   ;;  %s1044_s2 = inlined_call_operand.vmem [shape: f32[1,10], index: 2, kind: input, shape index: {}]   ;;  %s1045_s3 = inlined_call_operand.hbm [shape: f32[8,10], index: 3, kind: output, shape index: {}]  }
   0x1   :  { %v769_v0 = vld [vmem:[%s1043_s1 + $0x78] sm:$0xff]   ;;  %v773_v4 = vld [vmem:[%s1043_s1 + $0x70] sm:$0xff]   ;;  %v777_v8 = vld [vmem:[%s1043_s1 + $0x68] sm:$0xff]  }
   0x2   :  { %v770_v1 = vld [vmem:[%s1043_s1 + $0x38] sm:$0xff]   ;;  %692 = vmatprep.subr.bf16.mxu0 %v769_v0  ;;  %v774_v5 = vld [vmem:[%s1043_s1 + $0x30] sm:$0xff]   ;;  %v778_v9 = vld [vmem:[%s1043_s1 + $0x28] sm:$0xff]  }
   0x3   :  { %v771_v2 = vld [vmem:[%s1043_s1 + $0xf8] sm:$0xff]   ;;  %693 = vmatpush3.bf16.msra.mxu0 %v770_v1  ;;  %v775_v6 = vld [vmem:[%s1043_s1 + $0xf0] sm:$0xff]   ;;  %v779_v10 = vld [vmem:[%s1043_s1 + $0xe8] sm:$0xff]  }
   0x4   :  { %v772_v3 = vld [vmem:[%s1043_s1 + $0xb8] sm:$0xff]   ;;  %714 = vmatprep.subr.bf16.mxu1 %v771_v2  ;;  %694 = vmatprep.subr.bf16.mxu0 %v773_v4  ;;  %v776_v7 = vld [vmem:[%s1043_s1 + $0xb0] sm:$0xff]   ;;  %v780_v11 = vld [vmem:[%s1043_s1 + $0xa8] sm:$0xff]  }
   0x5   :  { %715 = vmatpush3.bf16.msra.mxu1 %v772_v3  ;;  %v781_v12 = vld [vmem:[%s1043_s1 + $0x60] sm:$0xff]   ;;  %v785_v16 = vld [vmem:[%s1043_s1 + $0x58] sm:$0xff]   ;;  %v789_v20 = vld [vmem:[%s1043_s1 + $0x50] sm:$0xff]  }
   0x6   :  { %716 = vmatprep.subr.bf16.mxu1 %v775_v6  ;;  %v782_v13 = vld [vmem:[%s1043_s1 + $0x20] sm:$0xff]   ;;  %v786_v17 = vld [vmem:[%s1043_s1 + $0x18] sm:$0xff]   ;;  %v790_v21 = vld [vmem:[%s1043_s1 + $0x10] sm:$0xff]  }
   0x7   :  { %695 = vmatpush3.bf16.msra.mxu0 %v774_v5  ;;  %v783_v14 = vld [vmem:[%s1043_s1 + $0xe0] sm:$0xff]   ;;  %v787_v18 = vld [vmem:[%s1043_s1 + $0xd8] sm:$0xff]   ;;  %v791_v22 = vld [vmem:[%s1043_s1 + $0xd0] sm:$0xff]  }
   0x8   :  { %696 = vmatprep.subr.bf16.mxu0 %v777_v8  ;;  %v784_v15 = vld [vmem:[%s1043_s1 + $0xa0] sm:$0xff]   ;;  %v788_v19 = vld [vmem:[%s1043_s1 + $0x98] sm:$0xff]   ;;  %v792_v23 = vld [vmem:[%s1043_s1 + $0x90] sm:$0xff]  }
   0x9   :  { %717 = vmatpush3.bf16.msra.mxu1 %v776_v7  ;;  %v793_v24 = vld [vmem:[%s1043_s1 + $0x48] sm:$0xff]   ;;  %v797_v28 = vld [vmem:[%s1043_s1 + $0x40] sm:$0xff]   ;;  %v803_v35 = vld [vmem:[%s1043_s1 + $0x178] sm:$0xff]  }
   0xa   :  { %718 = vmatprep.subr.bf16.mxu1 %v779_v10  ;;  %v794_v25 = vld [vmem:[%s1043_s1 + $0x8] sm:$0xff]   ;;  %v798_v29 = vld [vmem:[%s1043_s1] sm:$0xff]   ;;  %v806_v39 = vld [vmem:[%s1043_s1 + $0x138] sm:$0xff]  }
   0xb   :  { %697 = vmatpush3.bf16.msra.mxu0 %v778_v9  ;;  %v795_v26 = vld [vmem:[%s1043_s1 + $0xc8] sm:$0xff]   ;;  %v799_v30 = vld [vmem:[%s1043_s1 + $0xc0] sm:$0xff]   ;;  %v807_v40 = vld [vmem:[%s1043_s1 + $0x170] sm:$0xff]  }
   0xc   :  { %698 = vmatprep.subr.bf16.mxu0 %v781_v12  ;;  %v796_v27 = vld [vmem:[%s1043_s1 + $0x88] sm:$0xff]   ;;  %v16_v31 = vld [vmem:[%s1042_s0] sm:$0xff]  ;;  %v808_v41 = vld [vmem:[%s1043_s1 + $0x130] sm:$0xff]  }
   0xd   :  { %719 = vmatpush3.bf16.msra.mxu1 %v780_v11  ;;  %v635_v32 = vcombine.low %v16_v31, %v16_v31  ;;  %v636_v33 = vcombine.high %v16_v31, %v16_v31  ;;  %v802_v34 = vld [vmem:[%s1043_s1 + $0x80] sm:$0xff]   ;;  %v17_v36 = vld [vmem:[%s1042_s0 + $0x8] sm:$0xff]  ;;  %v813_v47 = vld [vmem:[%s1043_s1 + $0x158] sm:$0xff]  }
   0xe   :  { %720 = vmatprep.subr.bf16.mxu1 %v783_v14  ;;  %v637_v37 = vcombine.low %v17_v36, %v17_v36  ;;  %v638_v38 = vcombine.high %v17_v36, %v17_v36  ;;  %v809_v42 = vld [vmem:[%s1043_s1 + $0x168] sm:$0xff]   ;;  %v811_v45 = vld [vmem:[%s1043_s1 + $0x160] sm:$0xff]   ;;  %v814_v48 = vld [vmem:[%s1043_s1 + $0x118] sm:$0xff]  }
   0xf   :  { %699 = vmatpush3.bf16.msra.mxu0 %v782_v13  ;;  %479 = vmatprep.mubr.bf16.mxu0 %v636_v33  ;;  %v810_v44 = vld [vmem:[%s1043_s1 + $0x128] sm:$0xff]   ;;  %v812_v46 = vld [vmem:[%s1043_s1 + $0x120] sm:$0xff]   ;;  %v815_v49 = vld [vmem:[%s1043_s1 + $0x150] sm:$0xff]  }
  0x10   :  { %700 = vmatprep.subr.bf16.mxu0 %v785_v16  ;;  %519 = vmatprep.mubr.bf16.mxu1 %v638_v38  ;;  %v821_v50 = vld [vmem:[%s1043_s1 + $0x180] sm:$0xff]   ;;  %v18_v51 = vld [vmem:[%s1042_s0 + $0x10] sm:$0xff]  ;;  %v824_v53 = vld [vmem:[%s1042_s0 + $0x18] ss:$0 sps:$4 sm:$0xff]  }
  0x11   :  { %721 = vmatpush3.bf16.msra.mxu1 %v784_v15  ;;  %v640_v52 = vcombine.high %v18_v51, %v18_v51 }
  0x12   :  { %722 = vmatprep.subr.bf16.mxu1 %v787_v18 }
  0x13   :  { %701 = vmatpush3.bf16.msra.mxu0 %v786_v17 }
  0x14   :  { %702 = vmatprep.subr.bf16.mxu0 %v789_v20 }
  0x15   :  { %723 = vmatpush3.bf16.msra.mxu1 %v788_v19 }
  0x16   :  { %724 = vmatprep.subr.bf16.mxu1 %v791_v22 }
  0x17   :  { %703 = vmatpush3.bf16.msra.mxu0 %v790_v21 }
  0x18   :  { %704 = vmatprep.subr.bf16.mxu0 %v793_v24 }
  0x19   :  { %725 = vmatpush3.bf16.msra.mxu1 %v792_v23 }
  0x1a   :  { %726 = vmatprep.subr.bf16.mxu1 %v795_v26 }
  0x1b   :  { %705 = vmatpush3.bf16.msra.mxu0 %v794_v25 }
  0x1c   :  { %706 = vmatprep.subr.bf16.mxu0 %v797_v28 }
  0x1d   :  { %727 = vmatpush3.bf16.msra.mxu1 %v796_v27 }
  0x1e   :  { %728 = vmatprep.subr.bf16.mxu1 %v799_v30 }
  0x1f   :  { %707 = vmatpush3.bf16.msra.mxu0 %v798_v29 }
  0x20   :  { %736 = vmatprep.subr.bf16.mxu0 %v803_v35 }
  0x21   :  { %729 = vmatpush3.bf16.msra.mxu1 %v802_v34 }
  0x22   :  { %480 = vmatmul.mubr.bf16.vlgmr.msra.gmra.mxu0 %v635_v32  ;;  %760 = vmatprep.subr.bf16.mxu1 %v851_v43 }
  0x23   :  { %737 = vmatpush3.bf16.msra.mxu0 %v806_v39 }
  0x24   :  { %520 = vmatmul.mubr.bf16.vlgmr.msra.gmra.mxu1 %v637_v37  ;;  %738 = vmatprep.subr.bf16.mxu0 %v807_v40 }
  0x25   :  { %762 = vmatprep.mubr.msk.bf16.mxu1 %vm852_vm0, %v851_v43 }
  0x27   :  { %739 = vmatpush3.bf16.msra.mxu0 %v808_v41 }
  0x28   :  { %740 = vmatprep.subr.bf16.mxu0 %v809_v42 }
  0x2b   :  { %741 = vmatpush3.bf16.msra.mxu0 %v810_v44 }
  0x2c   :  { %742 = vmatprep.subr.bf16.mxu0 %v811_v45 }
  0x2f   :  { %743 = vmatpush3.bf16.msra.mxu0 %v812_v46 }
  0x30   :  { %744 = vmatprep.subr.bf16.mxu0 %v813_v47 }
  0x31   :  { %8 = vsyncpa [#allocation3], 0  ;;  %761 = vmatpush3.bf16.msra.mxu1 %v821_v50  ;;  %vm443_vm1 = vcmask 130048   ;;  %v816_v54 = vld [vmem:[%s1043_s1 + $0x110] sm:$0xff]   ;;  %559 = vmatprep.mubr.bf16.mxu0 %v640_v52  ;;  %v817_v55 = vld [vmem:[%s1043_s1 + $0x148] sm:$0xff]   ;;  %v639_v59 = vcombine.low %v18_v51, %v18_v51  ;;  %vm607_vm2 = vcmask 80896  }
  0x32   :  { %v818_v56 = vld [vmem:[%s1043_s1 + $0x108] sm:$0xff]   ;;  %v819_v57 = vld [vmem:[%s1043_s1 + $0x140] sm:$0xff]  }
  0x33   :  { %745 = vmatpush3.bf16.msra.mxu0 %v814_v48  ;;  %v820_v58 = vld [vmem:[%s1043_s1 + $0x100] sm:$0xff]   ;;  %s853_s1 = smov [#allocation2]  }
  0x34   :  { %746 = vmatprep.subr.bf16.mxu0 %v815_v49  ;;  %763 = vmatmul.mubr.msk.bf16.vlgmr.msra.gmra.mxu1 %vm443_vm1, %v824_v53  ;;  %v634_v9 = vld [vmem:[%s1044_s2] ss:$0 sm:$0xff]  ;;  %s626_s2 = sshll.u32 %s853_s1, 4  ;;  %s627_s2 = int_to_ptr.vmem [resolvable:$true] %s626_s2 }
  0x35   :  { %s829_s11 = scalar_lea.vmem %s627_s2, 128  ;;  %p834_p1 = scmp.lt.s32.totalorder %s627_s2, %s627_s2 }
  0x36   :  { %p830_p0 = scmp.ne.s32.totalorder %s627_s2, %s829_s11  ;;  %p835_p2 = scmp.lt.s32.totalorder %s829_s11, %s829_s11 }
  0x37   :  { %747 = vmatpush3.bf16.msra.mxu0 %v816_v54 }
  0x38   :  { %748 = vmatprep.subr.bf16.mxu0 %v817_v55  ;;  %p836_p3 = por %p835_p2, %p834_p1 }
  0x3a   :  { %p837_p4 = pnand %p836_p3, %p830_p0 }
  0x3b   :  { %749 = vmatpush3.bf16.msra.mxu0 %v818_v56 }
  0x3c   :  { %750 = vmatprep.subr.bf16.mxu0 %v819_v57 }
  0x3f   :  { %751 = vmatpush3.bf16.msra.mxu0 %v820_v58 }
  0x42   :  { %560 = vmatmul.mubr.bf16.vlgmr.msra.gmra.mxu0 %v639_v59 }
  0xe2   :  { %v708_v60 = vpop.f32.mrf.mxu0 }
  0xe4   :  { %v709_v61 = vpop.f32.mrf.mxu0  ;;  %v730_v62 = vpop.f32.mrf.mxu1 }
  0xe5   :  { %v710_v8 = vadd.f32 %v709_v61, %v708_v60 }
  0xe6   :  { %v711_v63 = vpop.f32.mrf.mxu0  ;;  %v731_v0 = vpop.f32.mrf.mxu1 }
  0xe7   :  { %v482_v10 = vadd.f32 %v710_v8, %v634_v9  ;;  %v732_v11 = vadd.f32 %v731_v0, %v730_v62 }
  0xe8   :  { %v712_v1 = vpop.f32.mrf.mxu0  ;;  %v733_v2 = vpop.f32.mrf.mxu1 }
  0xe9   :  { %v522_v14 = vadd.f32 %v732_v11, %v482_v10 }
  0xea   :  { %v734_v3 = vpop.f32.mrf.mxu1 }
  0xf4   :  { %v601_v4 = vpop.f32.mrf.mxu1 }
  0xf6   :  { %v764_v5 = vpop.f32.mrf.mxu1 }
  0xf8   :  { %v604_v6 = vpop.f32.mrf.mxu1 }
  0xfa   :  { %v765_v7 = vpop.f32.mrf.mxu1 }
 0x102   :  { %v752_v12 = vpop.f32.mrf.mxu0 }
 0x104   :  { %v753_v13 = vpop.f32.mrf.mxu0 }
 0x105   :  { %v754_v15 = vadd.f32 %v753_v13, %v752_v12 }
 0x106   :  { %v755_v16 = vpop.f32.mrf.mxu0 }
 0x107   :  { %v562_v17 = vadd.f32 %v754_v15, %v522_v14 }
 0x108   :  { %v756_v18 = vpop.f32.mrf.mxu0 }
 0x109   :  { %v602_v19 = vadd.f32 %v601_v4, %v562_v17 }
 0x10b   :  { %v608_v20 = vsel %vm607_vm2, %v602_v19, -inf }
 0x10c   :  { %609 = vmax.xlane.f32.xlu0 %v608_v20 }
 0x195   :  { %v610_v21 = vpop.xlane.xlu0 %609 }
 0x196   :  { %v611_v22 = vsub.f32 %v602_v19, %v610_v21 }
 0x198   :  { %v612_v23 = vmul.f32 1.442695, %v611_v22 }
 0x19a   :  { %825 = vpow2.f32 %v612_v23 }
 0x1a7   :  { %v826_v24 = vpop.eup %825 }
 0x1a8   :  { %v614_v25 = vsel %vm607_vm2, %v826_v24, 0.0 }
 0x1a9   :  { %615 = vadd.xlane.f32.xlu0 %v614_v25 }
 0x232   :  { %v616_v26 = vpop.xlane.xlu0 %615 }
 0x233   :  { %827 = vrcp.f32 %v616_v26 }
 0x240   :  { %v828_v27 = vpop.eup %827 }
 0x241   :  { %v618_v28 = vmul.f32 %v828_v27, %v826_v24 }
 0x243   :  { %619 = vst.msk [vmem:[#allocation2] sm:$0xff] %vm607_vm2, %v618_v28 }
 0x244   :  { %840 = shalt.err (!%p837_p4)
}
 0x245   :  { %629 = dma.vmem_to_hbm [thread:$0]  %s627_s2, 128, %s1045_s3, [#allocation3]  }
 0x246   :  { %849 = dma.done.wait [#allocation3], 128  }
 0x247   :  { %850 = vsyncadd [#allocation3], 4294967168 }
 0x248   :  { %633 = vsyncpa [#allocation3], 1 }

</bundles_post_ra>
